<compile_context>
chip_gen: v7x
topology: tpu7x:2x2x1
jax: 0.10.0
libtpu: 0.0.40
codegen_flags: <defaults>
</compile_context>

<pallas_src>
import functools

import jax
import jax.numpy as jnp
from jax.experimental import pallas as pl
from jax.experimental.pallas import tpu as pltpu

PPO_NETWORK_INPUT_SIZE = 32   # synthetic choice for the undefined global
HIDDEN = 64
MAX_TILE_B = 16384            # rows per grid step (f32; 12 MiB double-buffered in+out)
MIN_SPLIT_B = 2048            # above this, force >=2 grid steps so both v7x TCs get work


def obs_encoder_kernel(x_ref, wt_ref, b_ref, o_ref):
    # x_ref: (TB, D_in)  wt_ref: (D_in, 64)  b_ref: (1, 64)  o_ref: (TB, 64)
    x = x_ref[...]
    wt = wt_ref[...]
    b = b_ref[...]
    # Canonical (M,K)x(K,N) matmul on the MXU; accumulate in f32.
    y = jnp.dot(x, wt, preferred_element_type=jnp.float32) + b
    o_ref[...] = jnp.maximum(y, 0.0).astype(o_ref.dtype)   # ReLU on the VPU


def _round_up(x, m):
    return ((x + m - 1) // m) * m


@functools.partial(jax.jit, static_argnames=())
def observation_encoder(obs, weight, bias):
    """relu(obs @ weight.T + bias), matching torch.relu(nn.Linear(...)(obs)).

    obs:    (B, PPO_NETWORK_INPUT_SIZE) f32
    weight: (64, PPO_NETWORK_INPUT_SIZE) f32  (PyTorch layout)
    bias:   (64,) f32
    """
    B, D_in = obs.shape

    # Tile batch: big tiles amortize the ~0.35 us/step fixed overhead (HBM-bound op).
    tb = min(MAX_TILE_B, _round_up(B, 8))
    # If the whole batch would land in a single tile but B is large enough that an
    # extra step is hidden, split into >=2 tiles so v7x's two TensorCores both work.
    if B >= MIN_SPLIT_B and pl.cdiv(B, tb) < 2:
        tb = _round_up(pl.cdiv(B, 2), 8)
    grid = (pl.cdiv(B, tb),)

    # One-time wrapper-side layout fixes (tiny arrays; free in XLA):
    w_t = weight.T                   # (D_in, 64): canonical K x N for the MXU
    b2d = bias.reshape(1, HIDDEN)    # 2D for TPU-friendly (sublane, lane) layout

    return pl.pallas_call(
        obs_encoder_kernel,
        out_shape=jax.ShapeDtypeStruct((B, HIDDEN), obs.dtype),
        grid_spec=pltpu.PrefetchScalarGridSpec(
            num_scalar_prefetch=0,
            grid=grid,
            in_specs=[
                pl.BlockSpec((tb, D_in), lambda i: (i, 0)),        # streamed batch tile
                pl.BlockSpec((D_in, HIDDEN), lambda i: (0, 0)),    # resident weight
                pl.BlockSpec((1, HIDDEN), lambda i: (0, 0)),       # resident bias
            ],
            out_specs=pl.BlockSpec((tb, HIDDEN), lambda i: (i, 0)),
        ),
        compiler_params=pltpu.CompilerParams(
            # Batch rows are independent -> shard grid across TensorCores on v7x.
            dimension_semantics=("parallel",),
            # Double-buffered 16K-row obs/out tiles + resident params ~= 12 MiB;
            # 32 MiB is safe on v5e/v6e (128 MiB) and v7x (64 MiB physical).
            vmem_limit_bytes=32 * 1024 * 1024,
        ),
    )(obs, w_t, b2d)


if __name__ == "__main__":
    key = jax.random.PRNGKey(0)
    k_obs, k_w, k_b = jax.random.split(key, 3)

    batch = 64   # small example batch (multiple of 8 sublanes)
    obs = jax.random.normal(k_obs, (batch, PPO_NETWORK_INPUT_SIZE), dtype=jnp.float32)

    # Deterministic parameter init (PyTorch nn.Linear shapes: W (64, in), b (64,))
    bound = 1.0 / jnp.sqrt(PPO_NETWORK_INPUT_SIZE)
    weight = jax.random.uniform(
        k_w, (HIDDEN, PPO_NETWORK_INPUT_SIZE), jnp.float32, -bound, bound)
    bias = jax.random.uniform(k_b, (HIDDEN,), jnp.float32, -bound, bound)

    out = observation_encoder(obs, weight, bias)
    jax.block_until_ready(out)

    # Correctness check against the plain-JAX reference of the PyTorch forward.
    ref = jnp.maximum(obs @ weight.T + bias, 0.0)
    assert out.shape == (batch, HIDDEN)
    assert jnp.allclose(out, ref, atol=1e-5, rtol=1e-5)
    print("KERNEL_OK")
</pallas_src>

<mosaic_0001>
module attributes {stable_mosaic.version = 11 : i64} {
  func.func @obs_encoder_kernel(%arg0: i32, %arg1: memref<64x32xf32, #tpu.memory_space<vmem>>, %arg2: memref<32x64xf32, #tpu.memory_space<vmem>>, %arg3: memref<1x64xf32, #tpu.memory_space<vmem>>, %arg4: memref<64x64xf32, #tpu.memory_space<vmem>>) attributes {dimension_semantics = [#tpu.dimension_semantics<parallel>], iteration_bounds = array<i64: 1>, scalar_prefetch = 0 : i64, scratch_operands = 0 : i64, tpu.core_type = #tpu.core_type<tc>, window_params = [{transform_indices = @transform_0, window_bounds = array<i64: 64, 32>}, {pipeline_mode = #tpu.pipeline_mode<synchronous>, transform_indices = @transform_1, window_bounds = array<i64: 32, 64>}, {pipeline_mode = #tpu.pipeline_mode<synchronous>, transform_indices = @transform_2, window_bounds = array<i64: 1, 64>}, {transform_indices = @transform_3, window_bounds = array<i64: 64, 64>}]} {
    %c0 = arith.constant 0 : index
    %c0_0 = arith.constant 0 : index
    %0 = vector.load %arg1[%c0, %c0_0] : memref<64x32xf32, #tpu.memory_space<vmem>>, vector<64x32xf32>
    %c0_1 = arith.constant 0 : index
    %c0_2 = arith.constant 0 : index
    %1 = vector.load %arg2[%c0_1, %c0_2] : memref<32x64xf32, #tpu.memory_space<vmem>>, vector<32x64xf32>
    %c0_3 = arith.constant 0 : index
    %c0_4 = arith.constant 0 : index
    %2 = vector.load %arg3[%c0_3, %c0_4] : memref<1x64xf32, #tpu.memory_space<vmem>>, vector<1x64xf32>
    %cst = arith.constant dense<0.000000e+00> : vector<64x64xf32>
    %3 = tpu.matmul %0, %1, %cst {dimension_numbers = #tpu.dot_dimension_numbers<[1], [0], [0], [1], [0, 0, 1, 1], [], []>} : vector<64x32xf32>, vector<32x64xf32>, vector<64x64xf32> -> vector<64x64xf32>
    %4 = vector.broadcast %2 : vector<1x64xf32> to vector<64x64xf32>
    %5 = arith.addf %3, %4 : vector<64x64xf32>
    %cst_5 = arith.constant 0.000000e+00 : f32
    %6 = vector.broadcast %cst_5 : f32 to vector<64x64xf32>
    %7 = arith.maximumf %5, %6 : vector<64x64xf32>
    %c0_6 = arith.constant 0 : index
    %c0_7 = arith.constant 0 : index
    %8 = vector.load %arg4[%c0_6, %c0_7] : memref<64x64xf32, #tpu.memory_space<vmem>>, vector<64x64xf32>
    tpu.vector_store %arg4[%c0_6, %c0_7], %7 {strides = array<i32>} : memref<64x64xf32, #tpu.memory_space<vmem>>, vector<64x64xf32>,
    return
  }
  func.func @transform_0(%arg0: i32) -> (i32, i32) {
    %c0_i32 = arith.constant 0 : i32
    %c0_i32_0 = arith.constant 0 : i32
    return %arg0, %c0_i32 : i32, i32
  }
  func.func @transform_1(%arg0: i32) -> (i32, i32) {
    %c0_i32 = arith.constant 0 : i32
    %c0_i32_0 = arith.constant 0 : i32
    %c0_i32_1 = arith.constant 0 : i32
    return %c0_i32, %c0_i32_0 : i32, i32
  }
  func.func @transform_2(%arg0: i32) -> (i32, i32) {
    %c0_i32 = arith.constant 0 : i32
    %c0_i32_0 = arith.constant 0 : i32
    %c0_i32_1 = arith.constant 0 : i32
    return %c0_i32, %c0_i32_0 : i32, i32
  }
  func.func @transform_3(%arg0: i32) -> (i32, i32) {
    %c0_i32 = arith.constant 0 : i32
    %c0_i32_0 = arith.constant 0 : i32
    return %arg0, %c0_i32 : i32, i32
  }
}

</mosaic_0001>

<bundles_post_ra>
// kernel: observation_encoder.1
= control target key start
LH: loop header
LB: loop body
LE: loop exit
PB: predicated region body
PF: predicated region fallthrough
CT: control target
= control target key end

     0   :  { %vm34_vm0 = vcmask 261120   ;;  %s367_s0 = inlined_call_operand.vmem [shape: f32[64,32], index: 0, kind: input, shape index: {}]   ;;  %s368_s1 = inlined_call_operand.vmem [shape: f32[32,64], index: 1, kind: input, shape index: {}]   ;;  %s369_s2 = inlined_call_operand.vmem [shape: f32[1,64], index: 2, kind: input, shape index: {}]   ;;  %s370_s3 = inlined_call_operand.hbm [shape: f32[64,64], index: 3, kind: output, shape index: {}]  }
   0x1   :  { %v23_v0 = vld [vmem:[%s368_s1] sm:$0xff]  ;;  %v24_v1 = vld [vmem:[%s368_s1 + $0x8] sm:$0xff]  ;;  %v25_v2 = vld [vmem:[%s368_s1 + $0x10] sm:$0xff] }
   0x2   :  { %v238_v3 = vpack.c.bf16 %v24_v1, %v23_v0  ;;  %v26_v4 = vld [vmem:[%s368_s1 + $0x18] sm:$0xff]  ;;  %v15_v5 = vld [vmem:[%s367_s0] sm:$0xff] }
   0x3   :  { %v19_v6 = vld [vmem:[%s367_s0 + $0x20] sm:$0xff]  ;;  %v242_v7 = vpack.c.bf16 %v26_v4, %v25_v2  ;;  %226 = vmatprep.mubr.msk.f32.mxu0 %vm34_vm0, %v15_v5 }
   0x4   :  { %232 = vmatprep.mubr.msk.f32.mxu1 %vm34_vm0, %v19_v6  ;;  %239 = vmatprep.subr.bf16.mxu0 %v238_v3 }
   0x5   :  { %246 = vmatprep.subr.bf16.mxu1 %v238_v3  ;;  %241 = vmatpush3.bf16.msra.mxu0 %v238_v3 }
   0x6   :  { %248 = vmatpush3.bf16.msra.mxu1 %v238_v3 }
   0x7   :  { %8 = vsyncpa [#allocation3], 0  ;;  %243 = vmatprep.subr.bf16.mxu0 %v242_v7  ;;  %247 = vmatprep.subr.bf16.mxu1 %v242_v7  ;;  %v16_v8 = vld [vmem:[%s367_s0 + $0x8] sm:$0xff]  ;;  %v17_v10 = vld [vmem:[%s367_s0 + $0x10] sm:$0xff]  ;;  %vm172_vm1 = vcmask 523264  }
   0x8   :  { %v20_v9 = vld [vmem:[%s367_s0 + $0x28] sm:$0xff]  ;;  %v21_v11 = vld [vmem:[%s367_s0 + $0x30] sm:$0xff]  ;;  %v18_v12 = vld [vmem:[%s367_s0 + $0x18] sm:$0xff] }
   0x9   :  { %245 = vmatpush3.bf16.msra.mxu0 %v242_v7  ;;  %v22_v13 = vld [vmem:[%s367_s0 + $0x38] sm:$0xff]  ;;  %v197_v14 = vld [vmem:[%s369_s2] ss:$0 sm:$0xff]  ;;  %s277_s0 = smov [#allocation2]  }
   0xa   :  { %249 = vmatpush3.bf16.msra.mxu1 %v242_v7  ;;  %s186_s10 = sshll.u32 %s277_s0, 4  ;;  %s187_s10 = int_to_ptr.vmem [resolvable:$true] %s186_s10 }
   0xb   :  { %s253_s2 = scalar_lea.vmem %s187_s10, 1024  ;;  %p258_p1 = scmp.lt.s32.totalorder %s187_s10, %s187_s10 }
   0xc   :  { %227 = vmatmul.mubr.msk.f32.vlgmr.msra.gmra.mrb[0].mxu0 %vm34_vm0, %v16_v8  ;;  %p254_p0 = scmp.ne.s32.totalorder %s187_s10, %s253_s2  ;;  %p259_p2 = scmp.lt.s32.totalorder %s253_s2, %s253_s2 }
   0xd   :  { %233 = vmatmul.mubr.msk.f32.vlgmr.msra.gmra.mrb[0].mxu1 %vm34_vm0, %v20_v9  ;;  %229 = vmatprep.mubr.msk.f32.mxu0 %vm34_vm0, %v17_v10 }
   0xe   :  { %235 = vmatprep.mubr.msk.f32.mxu1 %vm34_vm0, %v21_v11  ;;  %p260_p3 = por %p259_p2, %p258_p1 }
  0x10   :  { %230 = vmatmul.mubr.msk.f32.gmra.mrb[2].mxu0 %vm34_vm0, %v18_v12  ;;  %p261_p4 = pnand %p260_p3, %p254_p0 }
  0x11   :  { %236 = vmatmul.mubr.msk.f32.gmra.mrb[2].mxu1 %vm34_vm0, %v22_v13 }
  0xdf   :  { %v228_v15 = vpop.f32.mrb[0].mxu0 }
  0xe0   :  { %v234_v16 = vpop.f32.mrb[0].mxu1  ;;  %v131_v17 = vadd.f32 %v228_v15, %v197_v14  ;;  %v125_v19 = vpop.f32.mrb[1].mxu0 }
  0xe1   :  { %v151_v18 = vadd.f32 %v234_v16, %v197_v14  ;;  %v145_v20 = vpop.f32.mrb[1].mxu1  ;;  %v126_v21 = vadd.f32 %v197_v14, %v125_v19 }
  0xe2   :  { %v146_v22 = vadd.f32 %v197_v14, %v145_v20  ;;  %v165_v23 = vmax.f32 %v131_v17, 0.0 }
  0xe3   :  { %v169_v24 = vmax.f32 %v151_v18, 0.0  ;;  %v164_v25 = vmax.f32 %v126_v21, 0.0  ;;  %v231_v27 = vpop.f32.mrb[2].mxu0 }
  0xe4   :  { %v168_v26 = vmax.f32 %v146_v22, 0.0  ;;  %v237_v28 = vpop.f32.mrb[2].mxu1  ;;  %174 = vst.msk [vmem:[#allocation2 + $0x8] sm:$0xff] %vm172_vm1, %v165_v23  ;;  %v141_v29 = vadd.f32 %v231_v27, %v197_v14  ;;  %v135_v31 = vpop.f32.mrb[3].mxu0 }
  0xe5   :  { %178 = vst.msk [vmem:[#allocation2 + $0x28] sm:$0xff] %vm172_vm1, %v169_v24  ;;  %v161_v30 = vadd.f32 %v237_v28, %v197_v14  ;;  %v155_v32 = vpop.f32.mrb[3].mxu1  ;;  %173 = vst.msk [vmem:[#allocation2] sm:$0xff] %vm172_vm1, %v164_v25  ;;  %v136_v33 = vadd.f32 %v197_v14, %v135_v31 }
  0xe6   :  { %177 = vst.msk [vmem:[#allocation2 + $0x20] sm:$0xff] %vm172_vm1, %v168_v26  ;;  %v156_v34 = vadd.f32 %v197_v14, %v155_v32  ;;  %v167_v35 = vmax.f32 %v141_v29, 0.0 }
  0xe7   :  { %v171_v36 = vmax.f32 %v161_v30, 0.0  ;;  %v166_v37 = vmax.f32 %v136_v33, 0.0 }
  0xe8   :  { %v170_v38 = vmax.f32 %v156_v34, 0.0  ;;  %176 = vst.msk [vmem:[#allocation2 + $0x18] sm:$0xff] %vm172_vm1, %v167_v35 }
  0xe9   :  { %180 = vst.msk [vmem:[#allocation2 + $0x38] sm:$0xff] %vm172_vm1, %v171_v36  ;;  %175 = vst.msk [vmem:[#allocation2 + $0x10] sm:$0xff] %vm172_vm1, %v166_v37 }
  0xea   :  { %179 = vst.msk [vmem:[#allocation2 + $0x30] sm:$0xff] %vm172_vm1, %v170_v38 }
  0xeb   :  { %264 = shalt.err (!%p261_p4)
}
  0xec   :  { %s265_s13 = scalar_lea.hbm %s370_s3, 1024 }
  0xed   :  { %p266_p5 = scmp.ne.s32.totalorder %s370_s3, %s265_s13  ;;  %p269_p6 = scmp.lt.u32.totalorder %s265_s13, %s370_s3 }
  0xef   :  { %p271_p7 = pnand %p269_p6, %p266_p5 }
  0xf1   :  { %274 = shalt.err (!%p271_p7)
}
  0xf2   :  { %s278_s18 = smov 128   ;;  %s279_s19 = smov 8  }
  0xf3   :  { %192 = dma.vmem_to_hbm [thread:$0]  %s187_s10, 1024, %s370_s3, [#allocation3], %s278_s18, %s278_s18, %s279_s19  }
  0xf4   :  { %275 = dma.done.wait [#allocation3], 1024  }
  0xf5   :  { %276 = vsyncadd [#allocation3], 4294966272 }
  0xf6   :  { %196 = vsyncpa [#allocation3], 1 }

</bundles_post_ra>
